<compile_context>
chip_gen: v7x
topology: tpu7x:2x2x1
jax: 0.10.0
libtpu: 0.0.40
codegen_flags: <defaults>
</compile_context>

<pallas_src>
import jax
import jax.numpy as jnp
from jax.experimental import pallas as pl
from jax.experimental.pallas import tpu as pltpu

LANE = 128
BF16_SUBLANE = 16  # bf16 packs 16 rows per vreg


def _round_up(x, m):
    return ((x + m - 1) // m) * m


# --------------------------------------------------------------------------
# Kernel
# --------------------------------------------------------------------------
def critic_kernel(s_ref, a_ref, w1s_ref, w1a_ref, b1_ref, w2_ref, b2_ref,
                  w3t_ref, b3_ref, out_ref):
    f32 = jnp.float32
    bf16 = jnp.bfloat16

    # fc1 + ReLU: split matmul over the (state, action) concatenation.
    h1 = jnp.dot(s_ref[...].astype(bf16), w1s_ref[...],
                 preferred_element_type=f32)
    h1 = h1 + jnp.dot(a_ref[...].astype(bf16), w1a_ref[...],
                      preferred_element_type=f32)
    h1 = jnp.maximum(h1 + b1_ref[...], 0.0)

    # fc2 + ReLU
    h2 = jnp.dot(h1.astype(bf16), w2_ref[...], preferred_element_type=f32)
    h2 = jnp.maximum(h2 + b2_ref[...], 0.0)

    # fc3 value head, computed transposed: (8, h_p) x (tb, h_p)^T -> (8, tb).
    # Row 0 of w3t is the real weight column, so row 0 of vt is the value for
    # every batch row, laid out along lanes -> lane-dense (1, tb) output block.
    vt = jax.lax.dot_general(
        w3t_ref[...], h2.astype(bf16),
        dimension_numbers=(((1,), (1,)), ((), ())),
        preferred_element_type=f32)
    out_ref[...] = vt[0:1, :] + b3_ref[...]


# --------------------------------------------------------------------------
# Parameters (PyTorch nn.Linear init, weights stored transposed [in, out])
# --------------------------------------------------------------------------
def init_critic_params(key, input_dim, hidden_dim):
    """Raw f32 params mirroring nn.Linear (weights stored transposed)."""
    ks = jax.random.split(key, 6)

    def lin(kw, kb, fan_in, fan_out):
        bound = 1.0 / (fan_in ** 0.5)
        w = jax.random.uniform(kw, (fan_in, fan_out), jnp.float32, -bound, bound)
        b = jax.random.uniform(kb, (fan_out,), jnp.float32, -bound, bound)
        return w, b

    w1, b1 = lin(ks[0], ks[1], input_dim, hidden_dim)
    w2, b2 = lin(ks[2], ks[3], hidden_dim, hidden_dim)
    w3, b3 = lin(ks[4], ks[5], hidden_dim, 1)
    return (w1, b1, w2, b2, w3, b3)


def pack_critic_params(raw_params, state_dim):
    """Kernel-ready params:
       * hidden dim zero-padded to the 128-lane width,
       * w1 split at state_dim (state rows / action rows), stored bf16,
       * w3 stored transposed, sublane-padded to 8 rows (row 0 real), bf16,
       * biases f32, shaped (1, D) for sublane broadcast / (1, 1) scalar."""
    w1, b1, w2, b2, w3, b3 = raw_params
    _, h = w1.shape
    h_p = _round_up(h, LANE)

    def pad_cols(w):
        return jnp.pad(w, ((0, 0), (0, h_p - w.shape[1]))).astype(jnp.bfloat16)

    w1s = pad_cols(w1[:state_dim])                                  # (S, h_p)
    w1a = pad_cols(w1[state_dim:])                                  # (A, h_p)
    w2p = jnp.pad(w2, ((0, h_p - h), (0, h_p - h))).astype(jnp.bfloat16)
    w3t = (jnp.zeros((8, h_p), jnp.float32)
           .at[0, :h].set(w3[:, 0]).astype(jnp.bfloat16))           # (8, h_p)

    def pad_b(b):
        return jnp.pad(b, (0, h_p - b.shape[0])).reshape(1, h_p).astype(jnp.float32)

    return (w1s, w1a, pad_b(b1), w2p, pad_b(b2), w3t,
            b3.reshape(1, 1).astype(jnp.float32))


# --------------------------------------------------------------------------
# Wrapper
# --------------------------------------------------------------------------
def _choose_tile_b(B, tile_b):
    """Batch-tile rows: multiple of 16 (bf16 sublane packing).  For batches
    big enough to split, use >= 2 tiles (v7x megacore) whose row count is a
    multiple of 128 so the transposed (1, tb) output block stays lane-dense."""
    if B <= 256:
        return _round_up(B, BF16_SUBLANE)
    half = _round_up((B + 1) // 2, LANE)
    return min(max(_round_up(tile_b, LANE), LANE), half)


def critic_forward(state, action, packed_params, *, tile_b=1024):
    """state: [B, S], action: [B, A] -> value [B, 1] (f32)."""
    w1s, w1a, b1, w2, b2, w3t, b3 = packed_params
    B, S = state.shape
    A = action.shape[1]
    h_p = w2.shape[0]

    tb = _choose_tile_b(B, tile_b)
    b_pad = _round_up(B, tb)
    if b_pad != B:
        state = jnp.pad(state, ((0, b_pad - B), (0, 0)))
        action = jnp.pad(action, ((0, b_pad - B), (0, 0)))

    grid = (b_pad // tb,)
    flops = 2 * b_pad * h_p * (S + A + h_p + 8)
    bytes_accessed = (b_pad * (S + A) * state.dtype.itemsize
                      + 2 * (w1s.size + w1a.size + w2.size + w3t.size)
                      + 4 * (b1.size + b2.size + b3.size)
                      + 4 * b_pad)

    const = lambda i: (0, 0)
    out = pl.pallas_call(
        critic_kernel,
        out_shape=jax.ShapeDtypeStruct((1, b_pad), jnp.float32),
        grid=grid,
        in_specs=[
            pl.BlockSpec((tb, S), lambda i: (i, 0)),     # state tile
            pl.BlockSpec((tb, A), lambda i: (i, 0)),     # action tile
            pl.BlockSpec((S, h_p), const),               # w1[:S]  (resident)
            pl.BlockSpec((A, h_p), const),               # w1[S:]  (resident)
            pl.BlockSpec((1, h_p), const),               # b1
            pl.BlockSpec((h_p, h_p), const),             # w2
            pl.BlockSpec((1, h_p), const),               # b2
            pl.BlockSpec((8, h_p), const),               # w3^T (row 0 real)
            pl.BlockSpec((1, 1), const),                 # b3
        ],
        out_specs=pl.BlockSpec((1, tb), lambda i: (0, i)),
        compiler_params=pltpu.CompilerParams(
            dimension_semantics=("parallel",),           # 2 TCs on v7x
            vmem_limit_bytes=32 * 1024 * 1024,
        ),
        cost_estimate=pl.CostEstimate(flops=flops, transcendentals=0,
                                      bytes_accessed=bytes_accessed),
    )(state, action, w1s, w1a, b1, w2, b2, w3t, b3)

    return out[0, :B].reshape(B, 1)


# --------------------------------------------------------------------------
# Pure-JAX reference (f32, unpadded) for correctness checking.
# --------------------------------------------------------------------------
def critic_reference(state, action, raw_params):
    w1, b1, w2, b2, w3, b3 = raw_params
    x = jnp.concatenate([state, action], axis=-1)
    h1 = jnp.maximum(x @ w1 + b1, 0.0)
    h2 = jnp.maximum(h1 @ w2 + b2, 0.0)
    return h2 @ w3 + b3


if __name__ == "__main__":
    # Small shapes consistent with the module's forward.
    state_dim, action_dim, hidden_dim = 16, 4, 32
    input_dim = state_dim + action_dim

    key = jax.random.PRNGKey(0)
    k_params, k_data = jax.random.split(key)
    raw_params = init_critic_params(k_params, input_dim, hidden_dim)
    packed_params = pack_critic_params(raw_params, state_dim)

    # Exercise both the single-tile path (B=8) and the multi-tile path (B=300).
    for batch in (8, 300):
        ks, ka = jax.random.split(jax.random.fold_in(k_data, batch))
        state = jax.random.normal(ks, (batch, state_dim), dtype=jnp.float32)
        action = jax.random.normal(ka, (batch, action_dim), dtype=jnp.float32)

        value = critic_forward(state, action, packed_params)
        jax.block_until_ready(value)
        ref = critic_reference(state, action, raw_params)

        assert value.shape == (batch, 1)
        assert bool(jnp.all(jnp.isfinite(value)))
        # bf16 matmul operands with f32 accumulation -> loose tolerance vs f32.
        assert bool(jnp.allclose(value, ref, atol=3e-2, rtol=3e-2)), (
            float(jnp.max(jnp.abs(value - ref))))

    print("KERNEL_OK")
</pallas_src>

<mosaic_0001>
module attributes {stable_mosaic.version = 11 : i64} {
  func.func @critic_kernel(%arg0: i32, %arg1: memref<16x16xf32, #tpu.memory_space<vmem>>, %arg2: memref<16x4xf32, #tpu.memory_space<vmem>>, %arg3: memref<16x128xbf16, #tpu.memory_space<vmem>>, %arg4: memref<4x128xbf16, #tpu.memory_space<vmem>>, %arg5: memref<1x128xf32, #tpu.memory_space<vmem>>, %arg6: memref<128x128xbf16, #tpu.memory_space<vmem>>, %arg7: memref<1x128xf32, #tpu.memory_space<vmem>>, %arg8: memref<8x128xbf16, #tpu.memory_space<vmem>>, %arg9: memref<1x1xf32, #tpu.memory_space<vmem>>, %arg10: memref<1x16xf32, #tpu.memory_space<vmem>>) attributes {dimension_semantics = [#tpu.dimension_semantics<parallel>], iteration_bounds = array<i64: 1>, scalar_prefetch = 0 : i64, scratch_operands = 0 : i64, tpu.core_type = #tpu.core_type<tc>, window_params = [{transform_indices = @transform_0, window_bounds = array<i64: 16, 16>}, {transform_indices = @transform_1, window_bounds = array<i64: 16, 4>}, {pipeline_mode = #tpu.pipeline_mode<synchronous>, transform_indices = @transform_2, window_bounds = array<i64: 16, 128>}, {pipeline_mode = #tpu.pipeline_mode<synchronous>, transform_indices = @transform_3, window_bounds = array<i64: 4, 128>}, {pipeline_mode = #tpu.pipeline_mode<synchronous>, transform_indices = @transform_4, window_bounds = array<i64: 1, 128>}, {pipeline_mode = #tpu.pipeline_mode<synchronous>, transform_indices = @transform_5, window_bounds = array<i64: 128, 128>}, {pipeline_mode = #tpu.pipeline_mode<synchronous>, transform_indices = @transform_6, window_bounds = array<i64: 1, 128>}, {pipeline_mode = #tpu.pipeline_mode<synchronous>, transform_indices = @transform_7, window_bounds = array<i64: 8, 128>}, {pipeline_mode = #tpu.pipeline_mode<synchronous>, transform_indices = @transform_8, window_bounds = array<i64: 1, 1>}, {transform_indices = @transform_9, window_bounds = array<i64: 1, 16>}]} {
    %c0 = arith.constant 0 : index
    %c0_0 = arith.constant 0 : index
    %0 = vector.load %arg1[%c0, %c0_0] : memref<16x16xf32, #tpu.memory_space<vmem>>, vector<16x16xf32>
    %1 = arith.truncf %0 : vector<16x16xf32> to vector<16x16xbf16>
    %c0_1 = arith.constant 0 : index
    %c0_2 = arith.constant 0 : index
    %2 = vector.load %arg3[%c0_1, %c0_2] : memref<16x128xbf16, #tpu.memory_space<vmem>>, vector<16x128xbf16>
    %cst = arith.constant dense<0.000000e+00> : vector<16x128xf32>
    %3 = tpu.matmul %1, %2, %cst {dimension_numbers = #tpu.dot_dimension_numbers<[1], [0], [0], [1], [0, 0, 1, 1], [], []>} : vector<16x16xbf16>, vector<16x128xbf16>, vector<16x128xf32> -> vector<16x128xf32>
    %c0_3 = arith.constant 0 : index
    %c0_4 = arith.constant 0 : index
    %4 = vector.load %arg2[%c0_3, %c0_4] : memref<16x4xf32, #tpu.memory_space<vmem>>, vector<16x4xf32>
    %5 = arith.truncf %4 : vector<16x4xf32> to vector<16x4xbf16>
    %c0_5 = arith.constant 0 : index
    %c0_6 = arith.constant 0 : index
    %6 = vector.load %arg4[%c0_5, %c0_6] : memref<4x128xbf16, #tpu.memory_space<vmem>>, vector<4x128xbf16>
    %cst_7 = arith.constant dense<0.000000e+00> : vector<16x128xf32>
    %7 = tpu.matmul %5, %6, %cst_7 {dimension_numbers = #tpu.dot_dimension_numbers<[1], [0], [0], [1], [0, 0, 1, 1], [], []>} : vector<16x4xbf16>, vector<4x128xbf16>, vector<16x128xf32> -> vector<16x128xf32>
    %8 = arith.addf %3, %7 : vector<16x128xf32>
    %c0_8 = arith.constant 0 : index
    %c0_9 = arith.constant 0 : index
    %9 = vector.load %arg5[%c0_8, %c0_9] : memref<1x128xf32, #tpu.memory_space<vmem>>, vector<1x128xf32>
    %10 = vector.broadcast %9 : vector<1x128xf32> to vector<16x128xf32>
    %11 = arith.addf %8, %10 : vector<16x128xf32>
    %cst_10 = arith.constant 0.000000e+00 : f32
    %12 = vector.broadcast %cst_10 : f32 to vector<16x128xf32>
    %13 = arith.maximumf %11, %12 : vector<16x128xf32>
    %14 = arith.truncf %13 : vector<16x128xf32> to vector<16x128xbf16>
    %c0_11 = arith.constant 0 : index
    %c0_12 = arith.constant 0 : index
    %15 = vector.load %arg6[%c0_11, %c0_12] : memref<128x128xbf16, #tpu.memory_space<vmem>>, vector<128x128xbf16>
    %cst_13 = arith.constant dense<0.000000e+00> : vector<16x128xf32>
    %16 = tpu.matmul %14, %15, %cst_13 {dimension_numbers = #tpu.dot_dimension_numbers<[1], [0], [0], [1], [0, 0, 1, 1], [], []>} : vector<16x128xbf16>, vector<128x128xbf16>, vector<16x128xf32> -> vector<16x128xf32>
    %c0_14 = arith.constant 0 : index
    %c0_15 = arith.constant 0 : index
    %17 = vector.load %arg7[%c0_14, %c0_15] : memref<1x128xf32, #tpu.memory_space<vmem>>, vector<1x128xf32>
    %18 = vector.broadcast %17 : vector<1x128xf32> to vector<16x128xf32>
    %19 = arith.addf %16, %18 : vector<16x128xf32>
    %cst_16 = arith.constant 0.000000e+00 : f32
    %20 = vector.broadcast %cst_16 : f32 to vector<16x128xf32>
    %21 = arith.maximumf %19, %20 : vector<16x128xf32>
    %c0_17 = arith.constant 0 : index
    %c0_18 = arith.constant 0 : index
    %22 = vector.load %arg8[%c0_17, %c0_18] : memref<8x128xbf16, #tpu.memory_space<vmem>>, vector<8x128xbf16>
    %23 = arith.truncf %21 : vector<16x128xf32> to vector<16x128xbf16>
    %cst_19 = arith.constant dense<0.000000e+00> : vector<8x16xf32>
    %24 = tpu.matmul %22, %23, %cst_19 {dimension_numbers = #tpu.dot_dimension_numbers<[1], [1], [0], [0], [0, 0, 1, 0], [], []>} : vector<8x128xbf16>, vector<16x128xbf16>, vector<8x16xf32> -> vector<8x16xf32>
    %25 = vector.extract_strided_slice %24 {offsets = [0, 0], sizes = [1, 16], strides = [1, 1]} : vector<8x16xf32> to vector<1x16xf32>
    %c0_20 = arith.constant 0 : index
    %c0_21 = arith.constant 0 : index
    %26 = vector.load %arg9[%c0_20, %c0_21] : memref<1x1xf32, #tpu.memory_space<vmem>>, vector<1x1xf32>
    %27 = vector.broadcast %26 : vector<1x1xf32> to vector<1x16xf32>
    %28 = arith.addf %25, %27 : vector<1x16xf32>
    %c0_22 = arith.constant 0 : index
    %c0_23 = arith.constant 0 : index
    %29 = vector.load %arg10[%c0_22, %c0_23] : memref<1x16xf32, #tpu.memory_space<vmem>>, vector<1x16xf32>
    tpu.vector_store %arg10[%c0_22, %c0_23], %28 {strides = array<i32>} : memref<1x16xf32, #tpu.memory_space<vmem>>, vector<1x16xf32>,
    return
  }
  func.func @transform_0(%arg0: i32) -> (i32, i32) {
    %c0_i32 = arith.constant 0 : i32
    %c0_i32_0 = arith.constant 0 : i32
    return %arg0, %c0_i32 : i32, i32
  }
  func.func @transform_1(%arg0: i32) -> (i32, i32) {
    %c0_i32 = arith.constant 0 : i32
    %c0_i32_0 = arith.constant 0 : i32
    return %arg0, %c0_i32 : i32, i32
  }
  func.func @transform_2(%arg0: i32) -> (i32, i32) {
    %c0_i32 = arith.constant 0 : i32
    %c0_i32_0 = arith.constant 0 : i32
    %c0_i32_1 = arith.constant 0 : i32
    return %c0_i32, %c0_i32_0 : i32, i32
  }
  func.func @transform_3(%arg0: i32) -> (i32, i32) {
    %c0_i32 = arith.constant 0 : i32
    %c0_i32_0 = arith.constant 0 : i32
    %c0_i32_1 = arith.constant 0 : i32
    return %c0_i32, %c0_i32_0 : i32, i32
  }
  func.func @transform_4(%arg0: i32) -> (i32, i32) {
    %c0_i32 = arith.constant 0 : i32
    %c0_i32_0 = arith.constant 0 : i32
    %c0_i32_1 = arith.constant 0 : i32
    return %c0_i32, %c0_i32_0 : i32, i32
  }
  func.func @transform_5(%arg0: i32) -> (i32, i32) {
    %c0_i32 = arith.constant 0 : i32
    %c0_i32_0 = arith.constant 0 : i32
    %c0_i32_1 = arith.constant 0 : i32
    return %c0_i32, %c0_i32_0 : i32, i32
  }
  func.func @transform_6(%arg0: i32) -> (i32, i32) {
    %c0_i32 = arith.constant 0 : i32
    %c0_i32_0 = arith.constant 0 : i32
    %c0_i32_1 = arith.constant 0 : i32
    return %c0_i32, %c0_i32_0 : i32, i32
  }
  func.func @transform_7(%arg0: i32) -> (i32, i32) {
    %c0_i32 = arith.constant 0 : i32
    %c0_i32_0 = arith.constant 0 : i32
    %c0_i32_1 = arith.constant 0 : i32
    return %c0_i32, %c0_i32_0 : i32, i32
  }
  func.func @transform_8(%arg0: i32) -> (i32, i32) {
    %c0_i32 = arith.constant 0 : i32
    %c0_i32_0 = arith.constant 0 : i32
    %c0_i32_1 = arith.constant 0 : i32
    return %c0_i32, %c0_i32_0 : i32, i32
  }
  func.func @transform_9(%arg0: i32) -> (i32, i32) {
    %c0_i32 = arith.constant 0 : i32
    %c0_i32_0 = arith.constant 0 : i32
    return %c0_i32, %arg0 : i32, i32
  }
}

</mosaic_0001>

<bundles_post_ra>
// kernel: tpu_custom_call.1
= control target key start
LH: loop header
LB: loop body
LE: loop exit
PB: predicated region body
PF: predicated region fallthrough
CT: control target
= control target key end

     0   :  { %s601_s0 = inlined_call_operand.vmem [shape: f32[16,16], index: 0, kind: input, shape index: {}]   ;;  %s602_s1 = inlined_call_operand.vmem [shape: f32[16,4], index: 1, kind: input, shape index: {}]   ;;  %s603_s2 = inlined_call_operand.vmem [shape: bf16[16,128], index: 2, kind: input, shape index: {}]   ;;  %s604_s3 = inlined_call_operand.vmem [shape: bf16[4,128], index: 3, kind: input, shape index: {}]   ;;  %s605_s4 = inlined_call_operand.vmem [shape: f32[1,128], index: 4, kind: input, shape index: {}]   ;;  %s606_s5 = inlined_call_operand.hbm [shape: bf16[128,128], index: 5, kind: input, shape index: {}]   ;;  %s607_s6 = inlined_call_operand.vmem [shape: f32[1,128], index: 6, kind: input, shape index: {}]   ;;  %s608_s7 = inlined_call_operand.vmem [shape: bf16[8,128], index: 7, kind: input, shape index: {}]   ;;  %s609_s8 = inlined_call_operand.<no memory space> [shape: f32[1,1], index: 8, kind: input, shape index: {}]   ;;  %s610_s9 = inlined_call_operand.hbm [shape: f32[1,16], index: 9, kind: output, shape index: {}]  }
   0x1   :  { %v14_v0 = vstv %s609_s8 }
   0x2   :  { %15 = vst [vmem:[#allocation2] sm:$0x1] %v14_v0 }
   0x3   :  { %16 = vsyncpa [#allocation4], 0 }
   0x4   :  { %17 = vsyncpa [#allocation5], 0  ;;  %s486_s11 = smov [#allocation3]   ;;  %s438_s15 = scalar_lea.hbm %s606_s5, 1024 }
   0x5   :  { %s33_s12 = sshll.u32 %s486_s11, 4  ;;  %p439_p0 = scmp.ne.s32.totalorder %s606_s5, %s438_s15  ;;  %s34_s12 = int_to_ptr.vmem [resolvable:$true] %s33_s12 }
   0x6   :  { %p442_p1 = scmp.lt.u32.totalorder %s438_s15, %s606_s5 }
   0x8   :  { %p444_p2 = pnand %p442_p1, %p439_p0 }
   0xa   :  { %447 = shalt.err (!%p444_p2)
}
   0xb   :  { %s448_s8 = scalar_lea.vmem %s34_s12, 1024  ;;  %p453_p4 = scmp.lt.s32.totalorder %s34_s12, %s34_s12 }
   0xc   :  { %p449_p3 = scmp.ne.s32.totalorder %s34_s12, %s448_s8  ;;  %p454_p5 = scmp.lt.s32.totalorder %s448_s8, %s448_s8 }
   0xe   :  { %p455_p6 = por %p454_p5, %p453_p4 }
  0x10   :  { %p456_p7 = pnand %p455_p6, %p449_p3 }
  0x12   :  { %459 = shalt.err (!%p456_p7)
}
  0x13   :  { %s487_s20 = smov 64   ;;  %s488_s21 = smov 4  }
  0x14   :  { %39 = dma.hbm_to_vmem [thread:$0]  %s606_s5, 1024, %s34_s12, [#allocation4], %s487_s20, %s487_s20, %s488_s21  }
  0x15   :  { %482 = dma.done.wait [#allocation4], 1024  }
  0x16   :  { %483 = vsyncadd [#allocation4], 4294966272  ;;  %v489_v1 = vmov 0.0   ;;  %vm490_vm0 = vmmov 0   ;;  %vm63_vm1 = vcmask 1041408   ;;  %v55_v3 = vld [vmem:[%s602_s1] sm:$0xff]  ;;  %v333_v48 = vlaneseq }
  0x17   :  { %383 = vmatprep.subr.bf16.mxu1 %v489_v1  ;;  %385 = vmatprep.mubr.msk.bf16.mxu1 %vm490_vm0, %v489_v1  ;;  %v58_v2 = vld [vmem:[%s604_s3] sm:$0x3]  ;;  %v56_v4 = vld [vmem:[%s602_s1 + $0x8] sm:$0xff]  ;;  %vm59_vm2 = vcmask 31744   ;;  %v432_v13 = vld [vmem:[#allocation3 + $0x10] sm:$0xff]   ;;  %vm114_vm3 = vcmask 130048  }
  0x18   :  { %395 = vmatprep.subr.bf16.mxu0 %v489_v1  ;;  %411 = vmatprep.mubr.msk.bf16.mxu0 %vm490_vm0, %v489_v1  ;;  %v65_v5 = vsel %vm63_vm1, %v58_v2, 0  ;;  %v57_v6 = vpack.c.bf16 %v56_v4, %v55_v3  ;;  %v429_v7 = vld [vmem:[%s603_s2] sm:$0xff]   ;;  %v51_v10 = vld [vmem:[%s601_s0 + $0x8] sm:$0xff]  ;;  %v436_v17 = vld [vmem:[#allocation3 + $0x30] sm:$0xff]   ;;  %v491_v36 = vmov 0   ;;  %v334_v49 = vshrl.u32 %v333_v48, 7 }
  0x19   :  { %384 = vmatpush3.bf16.msra.mxu1 %v65_v5  ;;  %v430_v8 = vld [vmem:[#allocation3] sm:$0xff]   ;;  %v431_v11 = vld [vmem:[#allocation3 + $0x8] sm:$0xff]   ;;  %v433_v14 = vld [vmem:[#allocation3 + $0x18] sm:$0xff]   ;;  %428 = vset.pattern.permute.xlu0 %v491_v36  ;;  %vm338_vm4 = vcmask 122880  }
  0x1a   :  { %389 = vmatprep.subr.bf16.mxu1 %v489_v1  ;;  %v50_v9 = vld [vmem:[%s601_s0] sm:$0xff]  ;;  %396 = vmatpush3.bf16.msra.mxu0 %v430_v8  ;;  %v435_v16 = vld [vmem:[#allocation3 + $0x28] sm:$0xff]   ;;  %v335_v50 = vsub.s32 0, %v334_v49 }
  0x1b   :  { %397 = vmatprep.subr.bf16.mxu0 %v489_v1  ;;  %v52_v12 = vpack.c.bf16 %v51_v10, %v50_v9  ;;  %v434_v15 = vld [vmem:[#allocation3 + $0x20] sm:$0xff]   ;;  %v437_v18 = vld [vmem:[#allocation3 + $0x38] sm:$0xff]  }
  0x1c   :  { %386 = vmatmul.mubr.msk.bf16.vlgmr.msra.gmra.mrb[0].mxu1 %vm59_vm2, %v57_v6  ;;  %v358_v24 = vld [vmem:[%s605_s4] ss:$0 sm:$0xff] }
  0x1d   :  { %390 = vmatpush3.bf16.msra.mxu1 %v429_v7  ;;  %391 = vmatprep.mubr.msk.bf16.mxu1 %vm490_vm0, %v489_v1  ;;  %v327_v35 = vld [vmem:[#allocation2] sm:$0x1] }
  0x1e   :  { %415 = vmatprep.subr.bf16.mxu1 %v489_v1  ;;  %398 = vmatpush3.bf16.msra.mxu0 %v431_v11  ;;  %v359_v37 = vld [vmem:[%s607_s6] ss:$0 sm:$0xff]  ;;  %s492_s6 = smov [#allocation6]  }
  0x1f   :  { %399 = vmatprep.subr.bf16.mxu0 %v489_v1  ;;  %330 = vperm.xlu0 %428, %v327_v35   ;;  %v285_v47 = vld [vmem:[%s608_s7] sm:$0xf]  ;;  %s346_s15 = sshll.u32 %s492_s6, 4  ;;  %s347_s15 = int_to_ptr.vmem [resolvable:$true] %s346_s15 }
  0x20   :  { %s460_s16 = scalar_lea.vmem %s347_s15, 16  ;;  %s464_s17 = scalar_lea.vmem %s347_s15, 32 }
  0x21   :  { %p461_p8 = scmp.ne.s32.totalorder %s347_s15, %s460_s16  ;;  %p465_p9 = scmp.lt.s32.totalorder %s347_s15, %s347_s15 }
  0x22   :  { %400 = vmatpush3.bf16.msra.mxu0 %v432_v13  ;;  %p466_p10 = scmp.lt.s32.totalorder %s464_s17, %s460_s16 }
  0x23   :  { %401 = vmatprep.subr.bf16.mxu0 %v489_v1 }
  0x24   :  { %392 = vmatmul.mubr.msk.bf16.vlgmr.msra.gmra.mrb[4].mxu1 %vm114_vm3, %v52_v12  ;;  %p467_p11 = por %p466_p10, %p465_p9 }
  0x25   :  { %417 = vmatprep.mubr.msk.bf16.mxu1 %vm490_vm0, %v489_v1 }
  0x26   :  { %402 = vmatpush3.bf16.msra.mxu0 %v433_v14  ;;  %p468_p12 = pnand %p467_p11, %p461_p8 }
  0x27   :  { %403 = vmatprep.subr.bf16.mxu0 %v489_v1 }
  0x2a   :  { %404 = vmatpush3.bf16.msra.mxu0 %v434_v15 }
  0x2b   :  { %405 = vmatprep.subr.bf16.mxu0 %v489_v1 }
  0x2e   :  { %406 = vmatpush3.bf16.msra.mxu0 %v435_v16 }
  0x2f   :  { %407 = vmatprep.subr.bf16.mxu0 %v489_v1 }
  0x32   :  { %408 = vmatpush3.bf16.msra.mxu0 %v436_v17 }
  0x33   :  { %409 = vmatprep.subr.bf16.mxu0 %v489_v1 }
  0x36   :  { %410 = vmatpush3.bf16.msra.mxu0 %v437_v18 }
  0x9e   :  { %v331_v51 = vpop.permute.xlu0 %330 }
  0x9f   :  { %v336_v52 = vrot.slane %v331_v51, %v335_v50 }
  0xef   :  { %v101_v19 = vpop.f32.mrb[0].mxu1 }
  0xf0   :  { %v387_v20 = vpop.f32.mrb[1].mxu1 }
  0xf1   :  { %v104_v21 = vpop.f32.mrb[2].mxu1 }
  0xf2   :  { %v388_v22 = vpop.f32.mrb[3].mxu1 }
  0xf7   :  { %v152_v23 = vpop.f32.mrb[4].mxu1 }
  0xf8   :  { %v153_v25 = vadd.f32 %v152_v23, %v101_v19  ;;  %v393_v26 = vpop.f32.mrb[5].mxu1 }
  0xf9   :  { %v155_v27 = vpop.f32.mrb[6].mxu1 }
  0xfa   :  { %v166_v28 = vadd.f32 %v358_v24, %v153_v25  ;;  %v156_v29 = vadd.f32 %v155_v27, %v104_v21  ;;  %v394_v30 = vpop.f32.mrb[7].mxu1 }
  0xfc   :  { %v167_v31 = vadd.f32 %v358_v24, %v156_v29  ;;  %v168_v32 = vmax.f32 %v166_v28, 0.0 }
  0xfe   :  { %v169_v33 = vmax.f32 %v167_v31, 0.0 }
 0x100   :  { %v170_v34 = vpack.c.bf16 %v169_v33, %v168_v32 }
 0x102   :  { %412 = vmatmul.mubr.bf16.vlgmr.msra.gmra.mrb[0].mxu0 %v170_v34 }
 0x1d5   :  { %v276_v38 = vpop.f32.mrb[0].mxu0 }
 0x1d6   :  { %v277_v39 = vadd.f32 %v359_v37, %v276_v38  ;;  %v413_v40 = vpop.f32.mrb[1].mxu0 }
 0x1d7   :  { %v279_v41 = vpop.f32.mrb[2].mxu0 }
 0x1d8   :  { %v280_v42 = vadd.f32 %v359_v37, %v279_v41  ;;  %v414_v43 = vpop.f32.mrb[3].mxu0  ;;  %v283_v44 = vmax.f32 %v277_v39, 0.0 }
 0x1da   :  { %v284_v45 = vmax.f32 %v280_v42, 0.0 }
 0x1dc   :  { %v286_v46 = vpack.c.bf16 %v284_v45, %v283_v44 }
 0x1de   :  { %416 = vmatpush3.bf16.xpose.msra.mxu1 %v286_v46 }
 0x1e5   :  { %418 = vmatmul.mubr.bf16.vlgmr.msra.gmra.mrb[8].mxu1 %v285_v47 }
 0x2b8   :  { %v321_v53 = vpop.f32.mrb[8].mxu1 }
 0x2b9   :  { %v337_v54 = vadd.f32 %v336_v52, %v321_v53  ;;  %v419_v55 = vpop.f32.mrb[9].mxu1 }
 0x2ba   :  { %v324_v56 = vpop.f32.mrb[10].mxu1 }
 0x2bb   :  { %v420_v57 = vpop.f32.mrb[11].mxu1  ;;  %339 = vst.msk [vmem:[#allocation6] sm:$0x1] %vm338_vm4, %v337_v54 }
 0x2bc   :  { %471 = shalt.err (!%p468_p12)
}
 0x2bd   :  { %s472_s19 = scalar_lea.hbm %s610_s9, 16 }
 0x2be   :  { %p473_p13 = scmp.ne.s32.totalorder %s610_s9, %s472_s19  ;;  %p476_p0 = scmp.lt.u32.totalorder %s472_s19, %s610_s9 }
 0x2c0   :  { %p478_p1 = pnand %p476_p0, %p473_p13 }
 0x2c2   :  { %481 = shalt.err (!%p478_p1)
}
 0x2c3   :  { %349 = dma.vmem_to_hbm [thread:$0]  %s347_s15, 16, %s610_s9, [#allocation5]  }
 0x2c4   :  { %484 = dma.done.wait [#allocation5], 16  }
 0x2c5   :  { %485 = vsyncadd [#allocation5], 4294967280 }
 0x2c6   :  { %353 = vsyncpa [#allocation4], 1 }
 0x2c7   :  { %354 = vsyncpa [#allocation5], 1 }

</bundles_post_ra>
